<compile_context>
chip_gen: v6e
topology: v6e:2x2x1
jax: 0.10.0
libtpu: 0.0.40
codegen_flags: <defaults>
</compile_context>

<pallas_src>
import jax
import jax.numpy as jnp
from jax import lax
from jax.experimental import pallas as pl
from jax.experimental.pallas import tpu as pltpu

BN_EPS = 1e-5


def critic_kernel(
    x_ref,                      # (TB, d_in)   f32
    w_pre_ref, b_pre_ref,       # (d_in, 64), (1, 64)  collapsed pre-tanh chain
    w_head_ref, b_head_ref,     # (1, 64), (1, 1)      bn2 + output head folded
    out_ref,                    # (1, TB)      f32  (lane-dense)
):
    # Single MXU pass for the whole pre-tanh linear chain, then tanh on the EUP.
    a = jnp.tanh(
        jnp.dot(x_ref[...], w_pre_ref[...], preferred_element_type=jnp.float32)
        + b_pre_ref[...])

    # Head: (1, 64) contracted with (TB, 64) over the 64-dim -> (1, TB)
    # lands lane-dense straight from the MXU (no XLU reduce, no column store).
    out_ref[...] = lax.dot_general(
        w_head_ref[...], a,
        dimension_numbers=(((1,), (1,)), ((), ())),
        preferred_element_type=jnp.float32) + b_head_ref[...]


def _round_up(x, m):
    return -(-x // m) * m


def _select_tiling(batch, block_batch):
    """Pick (nblocks, tb) so padding waste is bounded and v7x gets >=2 steps."""
    nblocks = max(1, -(-batch // block_batch))
    if batch >= 1024:
        # Ensure the "parallel" grid axis has an even number of steps so both
        # v7x TensorCores are used; per-step DMA is tiny so extra steps are free.
        nblocks = max(nblocks, 2)
        nblocks += nblocks % 2
    tb = _round_up(-(-batch // nblocks), 8)
    return nblocks, tb


def critic_forward(observation, action, kernel_params, *, block_batch=4096):
    """kernel_params must come from pack_params()."""
    w_pre, b_pre, w_head, b_head = kernel_params

    x = jnp.concatenate([observation, action], axis=-1).astype(jnp.float32)
    batch, d_in = x.shape

    nblocks, tb = _select_tiling(batch, block_batch)
    padded = nblocks * tb
    if padded != batch:
        x = jnp.pad(x, ((0, padded - batch), (0, 0)))

    def full(shape):
        return pl.BlockSpec(tuple(shape), lambda i: (0, 0))

    param_bytes = int(sum(int(p.size) * p.dtype.itemsize for p in kernel_params))
    flops = 2 * batch * (d_in * 64 + 64)
    bytes_accessed = param_bytes + int(x.size) * 4 + batch * 4

    out = pl.pallas_call(
        critic_kernel,
        out_shape=jax.ShapeDtypeStruct((nblocks, tb), jnp.float32),
        grid=(nblocks,),
        in_specs=[
            pl.BlockSpec((tb, d_in), lambda i: (i, 0)),
            full(w_pre.shape), full(b_pre.shape),
            full(w_head.shape), full(b_head.shape),
        ],
        out_specs=pl.BlockSpec((1, tb), lambda i: (i, 0)),
        compiler_params=pltpu.CompilerParams(
            dimension_semantics=("parallel",),
            vmem_limit_bytes=32 * 1024 * 1024),
        cost_estimate=pl.CostEstimate(
            flops=flops,
            transcendentals=batch * 64,
            bytes_accessed=bytes_accessed),
    )(x, w_pre, b_pre, w_head, b_head)

    # (nblocks, tb) row-major == batch order; drop padded rows, restore (batch, 1).
    return out.reshape(-1)[:batch].reshape(batch, 1)


def pack_params(params):
    """One-time packing: fuse obs/act FCs, fold eval-mode BNs, collapse the
    entire pre-tanh linear chain into one (d_in, 64) matmul.  All in f32."""
    (w_obs, b_obs, w_act, b_act, w1, b1,
     bn1_g, bn1_b, bn1_m, bn1_v,
     w2, b2,
     bn2_g, bn2_b, bn2_m, bn2_v,
     w_out, b_out) = params

    # Fuse observation_fc / action_fc into one matmul over concat([obs, act]).
    w_in = jnp.concatenate([w_obs, w_act], axis=0)          # (d_in, 128)
    b_in = b_obs + b_act                                     # (1, 128)

    # Fold eval-mode bn1 into merge_fc1.
    s1 = bn1_g * lax.rsqrt(bn1_v + BN_EPS)                   # (1, 256)
    w1f = w1 * s1                                             # (128, 256)
    b1f = (b1 - bn1_m) * s1 + bn1_b                           # (1, 256)

    # Collapse the purely-linear pre-tanh chain:
    #   z = ((x @ w_in + b_in) @ w1f + b1f) @ w2 + b2 = x @ w_pre + b_pre
    w_pre = w_in @ w1f @ w2                                   # (d_in, 64)
    b_pre = (b_in @ w1f + b1f) @ w2 + b2                      # (1, 64)

    # Fold eval-mode bn2 into the output head:
    #   y = (tanh_out * s2 + t2) @ w_out + b_out
    s2 = bn2_g * lax.rsqrt(bn2_v + BN_EPS)                    # (1, 64)
    t2 = bn2_b - bn2_m * s2                                   # (1, 64)
    w_head = (w_out * s2.reshape(-1, 1)).reshape(1, -1)       # (1, 64)
    b_head = t2 @ w_out + b_out                               # (1, 1)

    return (w_pre.astype(jnp.float32), b_pre.astype(jnp.float32),
            w_head.astype(jnp.float32), b_head.astype(jnp.float32))


def init_params(key, observation_dim, action_dim):
    """Deterministic synthetic parameters with the shapes implied by Critic.__init__."""
    ks = jax.random.split(key, 10)

    def lin(k, fan_in, fan_out):
        kw, kb = jax.random.split(k)
        scale = 1.0 / jnp.sqrt(fan_in)
        w = jax.random.uniform(kw, (fan_in, fan_out), jnp.float32, -scale, scale)
        b = jax.random.uniform(kb, (1, fan_out), jnp.float32, -scale, scale)
        return w, b

    w_obs, b_obs = lin(ks[0], observation_dim, 128)
    w_act, b_act = lin(ks[1], action_dim, 128)
    w1, b1 = lin(ks[2], 128, 256)
    w2, b2 = lin(ks[3], 256, 64)
    w_out, b_out = lin(ks[4], 64, 1)

    def bn(k, n):
        kg, kb, km, kv = jax.random.split(k, 4)
        gamma = 1.0 + 0.1 * jax.random.normal(kg, (1, n), jnp.float32)
        beta = 0.1 * jax.random.normal(kb, (1, n), jnp.float32)
        mean = 0.1 * jax.random.normal(km, (1, n), jnp.float32)
        var = jnp.abs(1.0 + 0.1 * jax.random.normal(kv, (1, n), jnp.float32))
        return gamma, beta, mean, var

    bn1_g, bn1_b, bn1_m, bn1_v = bn(ks[5], 256)
    bn2_g, bn2_b, bn2_m, bn2_v = bn(ks[6], 64)

    return (
        w_obs, b_obs,
        w_act, b_act,
        w1, b1,
        bn1_g, bn1_b, bn1_m, bn1_v,
        w2, b2,
        bn2_g, bn2_b, bn2_m, bn2_v,
        w_out, b_out,
    )


def critic_reference(observation, action, params):
    """Pure-JAX f32 reference with the original (unfused, unfolded) parameters."""
    (w_obs, b_obs, w_act, b_act, w1, b1,
     bn1_g, bn1_b, bn1_m, bn1_v,
     w2, b2,
     bn2_g, bn2_b, bn2_m, bn2_v,
     w_out, b_out) = params
    a = (observation @ w_obs + b_obs) + (action @ w_act + b_act)
    a = a @ w1 + b1
    a = (a - bn1_m) * lax.rsqrt(bn1_v + BN_EPS) * bn1_g + bn1_b
    a = jnp.tanh(a @ w2 + b2)
    a = (a - bn2_m) * lax.rsqrt(bn2_v + BN_EPS) * bn2_g + bn2_b
    return a @ w_out + b_out


if __name__ == "__main__":
    batch, observation_dim, action_dim = 8, 32, 8

    key = jax.random.PRNGKey(0)
    k_obs, k_act, k_par = jax.random.split(key, 3)

    observation = jax.random.normal(k_obs, (batch, observation_dim), jnp.float32)
    action = jax.random.normal(k_act, (batch, action_dim), jnp.float32)
    params = init_params(k_par, observation_dim, action_dim)
    kernel_params = pack_params(params)

    out = critic_forward(observation, action, kernel_params)
    out = jax.block_until_ready(out)

    ref = critic_reference(observation, action, params)
    assert out.shape == (batch, 1)
    # f32 chain-collapse reorders associativity + default MXU precision -> loose tol
    max_diff = float(jnp.max(jnp.abs(out - ref)))
    assert jnp.allclose(out, ref, atol=2e-2, rtol=2e-2), (
        f"mismatch vs reference: max abs diff = {max_diff}")

    print("KERNEL_OK")
</pallas_src>

<mosaic_0001>
module attributes {stable_mosaic.version = 11 : i64} {
  func.func @critic_kernel(%arg0: i32, %arg1: memref<8x40xf32, #tpu.memory_space<vmem>>, %arg2: memref<40x64xf32, #tpu.memory_space<vmem>>, %arg3: memref<1x64xf32, #tpu.memory_space<vmem>>, %arg4: memref<1x64xf32, #tpu.memory_space<vmem>>, %arg5: memref<1x1xf32, #tpu.memory_space<vmem>>, %arg6: memref<1x8xf32, #tpu.memory_space<vmem>>) attributes {dimension_semantics = [#tpu.dimension_semantics<parallel>], iteration_bounds = array<i64: 1>, scalar_prefetch = 0 : i64, scratch_operands = 0 : i64, tpu.core_type = #tpu.core_type<tc>, window_params = [{transform_indices = @transform_0, window_bounds = array<i64: 8, 40>}, {pipeline_mode = #tpu.pipeline_mode<synchronous>, transform_indices = @transform_1, window_bounds = array<i64: 40, 64>}, {pipeline_mode = #tpu.pipeline_mode<synchronous>, transform_indices = @transform_2, window_bounds = array<i64: 1, 64>}, {pipeline_mode = #tpu.pipeline_mode<synchronous>, transform_indices = @transform_3, window_bounds = array<i64: 1, 64>}, {pipeline_mode = #tpu.pipeline_mode<synchronous>, transform_indices = @transform_4, window_bounds = array<i64: 1, 1>}, {transform_indices = @transform_5, window_bounds = array<i64: 1, 8>}]} {
    %c0 = arith.constant 0 : index
    %c0_0 = arith.constant 0 : index
    %0 = vector.load %arg1[%c0, %c0_0] : memref<8x40xf32, #tpu.memory_space<vmem>>, vector<8x40xf32>
    %c0_1 = arith.constant 0 : index
    %c0_2 = arith.constant 0 : index
    %1 = vector.load %arg2[%c0_1, %c0_2] : memref<40x64xf32, #tpu.memory_space<vmem>>, vector<40x64xf32>
    %cst = arith.constant dense<0.000000e+00> : vector<8x64xf32>
    %2 = tpu.matmul %0, %1, %cst {dimension_numbers = #tpu.dot_dimension_numbers<[1], [0], [0], [1], [0, 0, 1, 1], [], []>} : vector<8x40xf32>, vector<40x64xf32>, vector<8x64xf32> -> vector<8x64xf32>
    %c0_3 = arith.constant 0 : index
    %c0_4 = arith.constant 0 : index
    %3 = vector.load %arg3[%c0_3, %c0_4] : memref<1x64xf32, #tpu.memory_space<vmem>>, vector<1x64xf32>
    %4 = vector.broadcast %3 : vector<1x64xf32> to vector<8x64xf32>
    %5 = arith.addf %2, %4 : vector<8x64xf32>
    %6 = math.tanh %5 : vector<8x64xf32>
    %c0_5 = arith.constant 0 : index
    %c0_6 = arith.constant 0 : index
    %7 = vector.load %arg4[%c0_5, %c0_6] : memref<1x64xf32, #tpu.memory_space<vmem>>, vector<1x64xf32>
    %cst_7 = arith.constant dense<0.000000e+00> : vector<1x8xf32>
    %8 = tpu.matmul %7, %6, %cst_7 {dimension_numbers = #tpu.dot_dimension_numbers<[1], [1], [0], [0], [0, 0, 1, 0], [], []>} : vector<1x64xf32>, vector<8x64xf32>, vector<1x8xf32> -> vector<1x8xf32>
    %c0_8 = arith.constant 0 : index
    %c0_9 = arith.constant 0 : index
    %9 = vector.load %arg5[%c0_8, %c0_9] : memref<1x1xf32, #tpu.memory_space<vmem>>, vector<1x1xf32>
    %10 = vector.broadcast %9 : vector<1x1xf32> to vector<1x8xf32>
    %11 = arith.addf %8, %10 : vector<1x8xf32>
    %c0_10 = arith.constant 0 : index
    %c0_11 = arith.constant 0 : index
    %12 = vector.load %arg6[%c0_10, %c0_11] : memref<1x8xf32, #tpu.memory_space<vmem>>, vector<1x8xf32>
    tpu.vector_store %arg6[%c0_10, %c0_11], %11 {strides = array<i32>} : memref<1x8xf32, #tpu.memory_space<vmem>>, vector<1x8xf32>,
    return
  }
  func.func @transform_0(%arg0: i32) -> (i32, i32) {
    %c0_i32 = arith.constant 0 : i32
    %c0_i32_0 = arith.constant 0 : i32
    return %arg0, %c0_i32 : i32, i32
  }
  func.func @transform_1(%arg0: i32) -> (i32, i32) {
    %c0_i32 = arith.constant 0 : i32
    %c0_i32_0 = arith.constant 0 : i32
    %c0_i32_1 = arith.constant 0 : i32
    return %c0_i32, %c0_i32_0 : i32, i32
  }
  func.func @transform_2(%arg0: i32) -> (i32, i32) {
    %c0_i32 = arith.constant 0 : i32
    %c0_i32_0 = arith.constant 0 : i32
    %c0_i32_1 = arith.constant 0 : i32
    return %c0_i32, %c0_i32_0 : i32, i32
  }
  func.func @transform_3(%arg0: i32) -> (i32, i32) {
    %c0_i32 = arith.constant 0 : i32
    %c0_i32_0 = arith.constant 0 : i32
    %c0_i32_1 = arith.constant 0 : i32
    return %c0_i32, %c0_i32_0 : i32, i32
  }
  func.func @transform_4(%arg0: i32) -> (i32, i32) {
    %c0_i32 = arith.constant 0 : i32
    %c0_i32_0 = arith.constant 0 : i32
    %c0_i32_1 = arith.constant 0 : i32
    return %c0_i32, %c0_i32_0 : i32, i32
  }
  func.func @transform_5(%arg0: i32) -> (i32, i32) {
    %c0_i32 = arith.constant 0 : i32
    %c0_i32_0 = arith.constant 0 : i32
    return %arg0, %c0_i32 : i32, i32
  }
}

</mosaic_0001>

<bundles_post_ra>
// kernel: tpu_custom_call.1
= control target key start
LH: loop header
LB: loop body
LE: loop exit
PB: predicated region body
PF: predicated region fallthrough
CT: control target
= control target key end

     0   :  { %s406_s0 = inlined_call_operand.hbm [shape: f32[8,40], index: 0, kind: input, shape index: {}]   ;;  %s407_s1 = inlined_call_operand.hbm [shape: f32[40,64], index: 1, kind: input, shape index: {}]   ;;  %s408_s2 = inlined_call_operand.vmem [shape: f32[1,64], index: 2, kind: input, shape index: {}]   ;;  %s409_s3 = inlined_call_operand.vmem [shape: f32[1,64], index: 3, kind: input, shape index: {}]   ;;  %s410_s4 = inlined_call_operand.<no memory space> [shape: f32[1,1], index: 4, kind: input, shape index: {}]   ;;  %s411_s5 = inlined_call_operand.hbm [shape: f32[1,8], index: 5, kind: output, shape index: {}]  }
   0x1   :  { %v10_v0 = vstv %s410_s4 }
   0x2   :  { %11 = vst [vmem:[#allocation2] sm:$0x1] %v10_v0 }
   0x3   :  { %12 = vsyncpa [#allocation4], 0 }
   0x4   :  { %13 = vsyncpa [#allocation7], 0 }
   0x5   :  { %14 = vsyncpa [#allocation5], 0  ;;  %s350_s20 = smov [#allocation3]   ;;  %s351_s22 = smov [#allocation6]  }
   0x6   :  { %s21_s21 = sshll.u32 %s350_s20, 4  ;;  %s30_s23 = sshll.u32 %s351_s22, 4  ;;  %s22_s21 = int_to_ptr.vmem [resolvable:$true] %s21_s21  ;;  %s31_s23 = int_to_ptr.vmem [resolvable:$true] %s30_s23 }
   0x7   :  { %s292_s24 = scalar_lea.vmem %s22_s21, 128  ;;  %p297_p1 = scmp.lt.s32.totalorder %s22_s21, %s22_s21 }
   0x8   :  { %p293_p0 = scmp.ne.s32.totalorder %s22_s21, %s292_s24  ;;  %p298_p2 = scmp.lt.s32.totalorder %s292_s24, %s292_s24 }
   0xa   :  { %p299_p3 = por %p298_p2, %p297_p1 }
   0xc   :  { %p300_p4 = pnand %p299_p3, %p293_p0 }
   0xe   :  { %303 = shalt.err (!%p300_p4)
}
   0xf   :  { %24 = dma.hbm_to_vmem [thread:$0]  %s406_s0, 128, %s22_s21, [#allocation4]  }
  0x10   :  { %s312_s4 = scalar_lea.vmem %s31_s23, 640  ;;  %p317_p6 = scmp.lt.s32.totalorder %s31_s23, %s31_s23 }
  0x11   :  { %p313_p5 = scmp.ne.s32.totalorder %s31_s23, %s312_s4  ;;  %p318_p7 = scmp.lt.s32.totalorder %s312_s4, %s312_s4 }
  0x13   :  { %p319_p8 = por %p318_p7, %p317_p6 }
  0x15   :  { %p320_p9 = pnand %p319_p8, %p313_p5 }
  0x17   :  { %323 = shalt.err (!%p320_p9)
}
  0x18   :  { %s352_s27 = smov 128   ;;  %s353_s28 = smov 8  }
  0x19   :  { %36 = dma.hbm_to_vmem [thread:$0]  %s407_s1, 640, %s31_s23, [#allocation7], %s352_s27, %s352_s27, %s353_s28  }
  0x1a   :  { %344 = dma.done.wait [#allocation4], 128  }
  0x1b   :  { %345 = vsyncadd [#allocation4], 4294967168 }
  0x1c   :  { %346 = dma.done.wait [#allocation7], 640  }
  0x1d   :  { %347 = vsyncadd [#allocation7], 4294966656  ;;  %v354_v1 = vmov 0.0   ;;  %vm355_vm0 = vmmov 0   ;;  %v54_v2 = vld [vmem:[#allocation6 + $0x20] sm:$0xff]  ;;  %v53_v3 = vld [vmem:[#allocation6 + $0x18] sm:$0xff]  ;;  %v144_v16 = vlaneseq }
  0x1e   :  { %255 = vmatprep.subr.mxu0 %v354_v1  ;;  %265 = vmatprep.mubr.msk.f32.mxu0 %vm355_vm0, %v354_v1  ;;  %v52_v4 = vld [vmem:[#allocation6 + $0x10] sm:$0xff]  ;;  %v51_v5 = vld [vmem:[#allocation6 + $0x8] sm:$0xff]  ;;  %v50_v6 = vld [vmem:[#allocation6] sm:$0xff]  ;;  %vm62_vm1 = vcmask 326656   ;;  %v356_v9 = vmov 0   ;;  %vm148_vm2 = vcmask 523264  }
  0x1f   :  { %268 = vmatprep.subr.mxu1 %v354_v1  ;;  %270 = vmatprep.mubr.msk.f32.mxu1 %vm355_vm0, %v354_v1  ;;  %v49_v7 = vld [vmem:[#allocation3] sm:$0xff]  ;;  %v138_v8 = vld [vmem:[#allocation2] sm:$0x1]  ;;  %v145_v17 = vshrl.u32 %v144_v16, 7  ;;  %s357_s8 = smov [#allocation8]   ;;  %vm225_vm3 = vcmask 57344  }
  0x20   :  { %256 = vmatpush3.msra.mxu0 %v54_v2  ;;  %281 = vset.pattern.permute.xlu0 %v356_v9  ;;  %v243_v10 = vld [vmem:[%s408_s2] ss:$0 sm:$0xff]  ;;  %s233_s9 = sshll.u32 %s357_s8, 4  ;;  %s234_s9 = int_to_ptr.vmem [resolvable:$true] %s233_s9 }
  0x21   :  { %257 = vmatprep.subr.mxu0 %v354_v1  ;;  %141 = vperm.xlu0 %281, %v138_v8   ;;  %v137_v15 = vld [vmem:[%s409_s3] sm:$0x1]  ;;  %v146_v18 = vsub.s32 0, %v145_v17  ;;  %s324_s2 = scalar_lea.vmem %s234_s9, 16  ;;  %s328_s10 = scalar_lea.vmem %s234_s9, 32 }
  0x22   :  { %258 = vmatpush3.msra.mxu0 %v53_v3  ;;  %p325_p10 = scmp.ne.s32.totalorder %s234_s9, %s324_s2  ;;  %p329_p11 = scmp.lt.s32.totalorder %s234_s9, %s234_s9 }
  0x23   :  { %259 = vmatprep.subr.mxu0 %v354_v1  ;;  %p330_p12 = scmp.lt.s32.totalorder %s328_s10, %s324_s2 }
  0x24   :  { %260 = vmatpush3.msra.mxu0 %v52_v4 }
  0x25   :  { %261 = vmatprep.subr.mxu0 %v354_v1  ;;  %p331_p13 = por %p330_p12, %p329_p11 }
  0x26   :  { %262 = vmatpush3.msra.mxu0 %v51_v5 }
  0x27   :  { %263 = vmatprep.subr.mxu0 %v354_v1  ;;  %p332_p0 = pnand %p331_p13, %p325_p10 }
  0x28   :  { %264 = vmatpush3.msra.mxu0 %v50_v6 }
  0x29   :  { %266 = vmatmul.mubr.msk.f32.vlgmr.msra.gmra.mxu0 %vm62_vm1, %v49_v7 }
  0x9c   :  { %v142_v19 = vpop.permute.xlu0 %141 }
  0x9d   :  { %v147_v20 = vrot.slane %v142_v19, %v146_v18 }
  0xe9   :  { %v132_v11 = vpop.f32.mrf.mxu0 }
  0xea   :  { %v133_v12 = vadd.f32 %v243_v10, %v132_v11 }
  0xeb   :  { %v267_v13 = vpop.f32.mrf.mxu0 }
  0xec   :  { %282 = vtanh.f32 %v133_v12 }
  0xf9   :  { %v283_v14 = vpop.eup %282 }
  0xfa   :  { %269 = vmatpush3.xpose.msk.msra.mxu1 %vm148_vm2, %v283_v14 }
  0xfd   :  { %271 = vmatmul.mubr.msk.f32.vlgmr.msra.gmra.mxu1 %vm148_vm2, %v137_v15 }
 0x1bd   :  { %v221_v21 = vpop.f32.mrf.mxu1 }
 0x1be   :  { %v222_v22 = vadd.f32 %v221_v21, %v147_v20 }
 0x1bf   :  { %v272_v23 = vpop.f32.mrf.mxu1 }
 0x1c0   :  { %226 = vst.msk [vmem:[#allocation8] sm:$0x1] %vm225_vm3, %v222_v22 }
 0x1c1   :  { %335 = shalt.err (!%p332_p0)
}
 0x1c2   :  { %236 = dma.vmem_to_hbm [thread:$0]  %s234_s9, 16, %s411_s5, [#allocation5]  }
 0x1c3   :  { %348 = dma.done.wait [#allocation5], 16  }
 0x1c4   :  { %349 = vsyncadd [#allocation5], 4294967280 }
 0x1c5   :  { %240 = vsyncpa [#allocation4], 1 }
 0x1c6   :  { %241 = vsyncpa [#allocation7], 1 }
 0x1c7   :  { %242 = vsyncpa [#allocation5], 1 }

</bundles_post_ra>
